<compile_context>
chip_gen: v6e
topology: v6e:2x2x1
jax: 0.10.0
libtpu: 0.0.40
codegen_flags: <defaults>
</compile_context>

<pallas_src>
import functools

import jax
import jax.numpy as jnp
from jax.experimental import pallas as pl
from jax.experimental.pallas import tpu as pltpu

LANES = 128  # vreg lane width; weight slab is stored lane-padded to 128


def policy_kernel(x_ref, p_ref, o_ref, *, s_size, h_size, a_size):
    """One batch tile of the policy MLP.

    x_ref : (TB, s_size)       raw flattened states (f32)
    p_ref : (SLAB_ROWS, 128)   packed [W1; W2; W3; b1; b2; b3] slab (f32)
    o_ref : (TB, a_size)       softmax action probabilities (f32)
    """
    x = x_ref[...]

    # F.normalize(x, p=2, dim=1, eps=1e-12): x / max(||x||_2, 1e-12).
    # Single EUP rsqrt; identical to 1/max(sqrt(ss), 1e-12).
    ss = jnp.sum(x * x, axis=1, keepdims=True)
    xn = x * jax.lax.rsqrt(jnp.maximum(ss, 1e-24))

    # Static views into the resident parameter slab (no extra DMAs).
    # Weights keep only their REAL K rows; lanes >= fan_out are zero.
    r_w2 = s_size
    r_w3 = s_size + h_size
    r_b = s_size + 2 * h_size
    w1 = p_ref[0:r_w2, :].astype(jnp.bfloat16)          # (s, 128)
    w2 = p_ref[r_w2:r_w3, :].astype(jnp.bfloat16)       # (h, 128)
    w3 = p_ref[r_w3:r_b, :].astype(jnp.bfloat16)        # (h, 128)
    b1 = p_ref[r_b + 0:r_b + 1, :]                       # (1, 128) f32
    b2 = p_ref[r_b + 1:r_b + 2, :]
    b3 = p_ref[r_b + 2:r_b + 3, :]

    # MLP body: bf16 operands on the MXU, f32 accumulation.  Contraction is
    # over the real K (16 / 32 / 32); padded output lanes stay exactly zero
    # because the padded weight columns and bias lanes are zero.
    h1 = jnp.maximum(
        jnp.dot(xn.astype(jnp.bfloat16), w1,
                preferred_element_type=jnp.float32) + b1, 0.0)
    h2 = jnp.maximum(
        jnp.dot(h1[:, :h_size].astype(jnp.bfloat16), w2,
                preferred_element_type=jnp.float32) + b2, 0.0)
    logits = jnp.dot(h2[:, :h_size].astype(jnp.bfloat16), w3,
                     preferred_element_type=jnp.float32) + b3

    # Softmax over the real a_size columns only: mask padded lanes to -inf
    # BEFORE the row max so exp never sees inf - inf.
    col = jax.lax.broadcasted_iota(jnp.int32, logits.shape, 1)
    logits = jnp.where(col < a_size, logits, -jnp.inf)
    m = jnp.max(logits, axis=1, keepdims=True)
    e = jnp.exp(logits - m)
    probs = e * pl.reciprocal(jnp.sum(e, axis=1, keepdims=True), approx=False)

    # Narrow, masked store: only the real action columns go back to HBM.
    o_ref[...] = probs[:, :a_size]


def slab_rows(s_size, h_size):
    rows = s_size + 2 * h_size + 3
    return ((rows + 7) // 8) * 8          # pad row count to a sublane multiple


def pack_params(w1, b1, w2, b2, w3, b3, *, s_size, h_size, a_size):
    """Pack all parameters (weights pre-transposed to (in, out)) into one
    compact, lane-padded f32 slab -> a single resident kernel input."""
    rows = slab_rows(s_size, h_size)
    r_w2 = s_size
    r_w3 = s_size + h_size
    r_b = s_size + 2 * h_size
    slab = jnp.zeros((rows, LANES), jnp.float32)
    slab = slab.at[0:s_size, 0:h_size].set(w1)
    slab = slab.at[r_w2:r_w2 + h_size, 0:h_size].set(w2)
    slab = slab.at[r_w3:r_w3 + h_size, 0:a_size].set(w3)
    slab = slab.at[r_b + 0, 0:h_size].set(b1)
    slab = slab.at[r_b + 1, 0:h_size].set(b2)
    slab = slab.at[r_b + 2, 0:a_size].set(b3)
    return slab


def _pick_tile(b, max_tile=1024):
    """Biggest tile that amortizes per-step overhead while keeping the grid
    >= 2 steps when possible (v7x has 2 TensorCores sharding the parallel
    axis).  1024 rows keeps live VMEM tiny on every generation."""
    half = (b + 1) // 2
    half = ((half + 7) // 8) * 8           # sublane multiple
    return max(8, min(max_tile, half))


def policy_forward_batch(states, packed_params, *, s_size, h_size, a_size,
                         tb=None):
    """Run the policy network on a batch of states (each flattened to s_size).
    Returns (B, a_size) action probabilities."""
    b = states.shape[0]
    x = jnp.reshape(states, (b, s_size)).astype(jnp.float32)

    if tb is None:
        tb = _pick_tile(b)
    bp = ((b + tb - 1) // tb) * tb
    if bp != b:
        # Zero rows are harmless: sum-sq 0 -> xn = 0, finite junk probs,
        # sliced off below.
        x = jnp.concatenate([x, jnp.zeros((bp - b, s_size), jnp.float32)],
                            axis=0)

    rows = packed_params.shape[0]
    out = pl.pallas_call(
        functools.partial(policy_kernel,
                          s_size=s_size, h_size=h_size, a_size=a_size),
        out_shape=jax.ShapeDtypeStruct((bp, a_size), jnp.float32),
        grid=(bp // tb,),
        in_specs=[
            # States: last dim == full array dim -> legal, un-padded block.
            pl.BlockSpec((tb, s_size), lambda i: (i, 0)),
            # Resident parameter slab: fetched once (constant index_map).
            pl.BlockSpec((rows, LANES), lambda i: (0, 0)),
        ],
        out_specs=pl.BlockSpec((tb, a_size), lambda i: (i, 0)),
        compiler_params=pltpu.CompilerParams(
            dimension_semantics=("parallel",)),
    )(x, packed_params)
    return out if bp == b else out[:b]


def policy_forward(x, packed_params, *, s_size, h_size, a_size):
    """Exact PolicyNetwork.forward semantics: flatten -> (1, s_size) -> probs.
    NOTE: a single state is pure dispatch/DMA overhead for a TPU kernel; in a
    real REINFORCE rollout, batch environment steps and call
    policy_forward_batch (or use the plain-JAX path) instead."""
    state = jnp.reshape(x, (1, s_size))
    return policy_forward_batch(state, packed_params,
                                s_size=s_size, h_size=h_size, a_size=a_size,
                                tb=8)


def init_params(key, s_size, h_size, a_size):
    """nn.Linear-style init (uniform +/- 1/sqrt(fan_in)); weights stored
    transposed as (in_features, out_features), biases as 1-D vectors."""
    keys = jax.random.split(key, 6)

    def linear(kw, kb, fan_in, fan_out):
        bound = 1.0 / float(fan_in) ** 0.5
        w = jax.random.uniform(kw, (fan_in, fan_out), jnp.float32, -bound, bound)
        b = jax.random.uniform(kb, (fan_out,), jnp.float32, -bound, bound)
        return w, b

    w1, b1 = linear(keys[0], keys[1], s_size, h_size)
    w2, b2 = linear(keys[2], keys[3], h_size, h_size)
    w3, b3 = linear(keys[4], keys[5], h_size, a_size)
    return (w1, b1, w2, b2, w3, b3)


def reference_forward(states, w1, b1, w2, b2, w3, b3):
    """Pure-JAX f32 reference of the PyTorch forward, applied row-wise."""
    x = jnp.reshape(states, (states.shape[0], -1)).astype(jnp.float32)
    n = jnp.sqrt(jnp.sum(x * x, axis=1, keepdims=True))
    xn = x / jnp.maximum(n, 1e-12)
    h1 = jnp.maximum(xn @ w1 + b1, 0.0)
    h2 = jnp.maximum(h1 @ w2 + b2, 0.0)
    return jax.nn.softmax(h2 @ w3 + b3, axis=1)


if __name__ == "__main__":
    s_size, h_size, a_size = 16, 32, 4

    key = jax.random.PRNGKey(0)
    k_x, k_s, k_p = jax.random.split(key, 3)

    params = init_params(k_p, s_size, h_size, a_size)
    slab = pack_params(*params, s_size=s_size, h_size=h_size, a_size=a_size)

    # Batched rollout: 256 raw states of shape (4, 4).  Auto tile -> tb=128,
    # grid=2 (both v7x TensorCores fed); larger batches get 512-1024 row tiles.
    states = jax.random.normal(k_s, (256, 4, 4), dtype=jnp.float32)
    probs_b = policy_forward_batch(states, slab,
                                   s_size=s_size, h_size=h_size, a_size=a_size)
    probs_b = jax.block_until_ready(probs_b)

    ref_b = reference_forward(states, *params)
    assert probs_b.shape == (256, a_size)
    assert bool(jnp.isfinite(probs_b).all())
    assert float(jnp.max(jnp.abs(jnp.sum(probs_b, axis=1) - 1.0))) < 1e-3
    # bf16 MXU operands vs the pure-f32 reference: ~1e-3 level deviations.
    assert bool(jnp.allclose(probs_b, ref_b, atol=1e-2, rtol=1e-2))

    # Exact single-state PyTorch semantics: flatten -> (1, 16) -> (1, 4) probs.
    x = jax.random.normal(k_x, (4, 4), dtype=jnp.float32)
    probs_1 = jax.block_until_ready(
        policy_forward(x, slab, s_size=s_size, h_size=h_size, a_size=a_size))
    ref_1 = reference_forward(x[None], *params)
    assert probs_1.shape == (1, a_size)
    assert bool(jnp.isfinite(probs_1).all())
    assert float(abs(jnp.sum(probs_1) - 1.0)) < 1e-3
    assert bool(jnp.allclose(probs_1, ref_1, atol=1e-2, rtol=1e-2))

    print("KERNEL_OK")
</pallas_src>

<mosaic_0001>
module attributes {stable_mosaic.version = 11 : i64} {
  func.func @policy_kernel(%arg0: i32, %arg1: memref<128x16xf32, #tpu.memory_space<vmem>>, %arg2: memref<88x128xf32, #tpu.memory_space<vmem>>, %arg3: memref<128x4xf32, #tpu.memory_space<vmem>>) attributes {dimension_semantics = [#tpu.dimension_semantics<parallel>], iteration_bounds = array<i64: 2>, scalar_prefetch = 0 : i64, scratch_operands = 0 : i64, tpu.core_type = #tpu.core_type<tc>, window_params = [{transform_indices = @transform_0, window_bounds = array<i64: 128, 16>}, {pipeline_mode = #tpu.pipeline_mode<synchronous>, transform_indices = @transform_1, window_bounds = array<i64: 88, 128>}, {transform_indices = @transform_2, window_bounds = array<i64: 128, 4>}]} {
    %c0 = arith.constant 0 : index
    %c0_0 = arith.constant 0 : index
    %0 = vector.load %arg1[%c0, %c0_0] : memref<128x16xf32, #tpu.memory_space<vmem>>, vector<128x16xf32>
    %1 = arith.mulf %0, %0 : vector<128x16xf32>
    %cst = arith.constant dense<0.000000e+00> : vector<128xf32>
    %2 = vector.multi_reduction <add>, %1, %cst [1] : vector<128x16xf32> to vector<128xf32>
    %3 = vector.shape_cast %2 : vector<128xf32> to vector<128x1xf32>
    %cst_1 = arith.constant 1.000000e-24 : f32
    %4 = vector.broadcast %cst_1 : f32 to vector<128x1xf32>
    %5 = arith.maximumf %3, %4 : vector<128x1xf32>
    %6 = math.rsqrt %5 : vector<128x1xf32>
    %7 = vector.broadcast %6 : vector<128x1xf32> to vector<128x16xf32>
    %8 = arith.mulf %0, %7 : vector<128x16xf32>
    %c0_2 = arith.constant 0 : index
    %c0_3 = arith.constant 0 : index
    %9 = vector.load %arg2[%c0_2, %c0_3] : memref<88x128xf32, #tpu.memory_space<vmem>>, vector<16x128xf32>
    %10 = arith.truncf %9 : vector<16x128xf32> to vector<16x128xbf16>
    %c16 = arith.constant 16 : index
    %c0_4 = arith.constant 0 : index
    %11 = vector.load %arg2[%c16, %c0_4] : memref<88x128xf32, #tpu.memory_space<vmem>>, vector<32x128xf32>
    %12 = arith.truncf %11 : vector<32x128xf32> to vector<32x128xbf16>
    %c48 = arith.constant 48 : index
    %c0_5 = arith.constant 0 : index
    %13 = vector.load %arg2[%c48, %c0_5] : memref<88x128xf32, #tpu.memory_space<vmem>>, vector<32x128xf32>
    %14 = arith.truncf %13 : vector<32x128xf32> to vector<32x128xbf16>
    %c80 = arith.constant 80 : index
    %c0_6 = arith.constant 0 : index
    %15 = vector.load %arg2[%c80, %c0_6] : memref<88x128xf32, #tpu.memory_space<vmem>>, vector<1x128xf32>
    %c81 = arith.constant 81 : index
    %c0_7 = arith.constant 0 : index
    %16 = vector.load %arg2[%c81, %c0_7] : memref<88x128xf32, #tpu.memory_space<vmem>>, vector<1x128xf32>
    %c82 = arith.constant 82 : index
    %c0_8 = arith.constant 0 : index
    %17 = vector.load %arg2[%c82, %c0_8] : memref<88x128xf32, #tpu.memory_space<vmem>>, vector<1x128xf32>
    %18 = arith.truncf %8 : vector<128x16xf32> to vector<128x16xbf16>
    %cst_9 = arith.constant dense<0.000000e+00> : vector<128x128xf32>
    %19 = tpu.matmul %18, %10, %cst_9 {dimension_numbers = #tpu.dot_dimension_numbers<[1], [0], [0], [1], [0, 0, 1, 1], [], []>} : vector<128x16xbf16>, vector<16x128xbf16>, vector<128x128xf32> -> vector<128x128xf32>
    %20 = vector.broadcast %15 : vector<1x128xf32> to vector<128x128xf32>
    %21 = arith.addf %19, %20 : vector<128x128xf32>
    %cst_10 = arith.constant 0.000000e+00 : f32
    %22 = vector.broadcast %cst_10 : f32 to vector<128x128xf32>
    %23 = arith.maximumf %21, %22 : vector<128x128xf32>
    %24 = vector.extract_strided_slice %23 {offsets = [0, 0], sizes = [128, 32], strides = [1, 1]} : vector<128x128xf32> to vector<128x32xf32>
    %25 = arith.truncf %24 : vector<128x32xf32> to vector<128x32xbf16>
    %cst_11 = arith.constant dense<0.000000e+00> : vector<128x128xf32>
    %26 = tpu.matmul %25, %12, %cst_11 {dimension_numbers = #tpu.dot_dimension_numbers<[1], [0], [0], [1], [0, 0, 1, 1], [], []>} : vector<128x32xbf16>, vector<32x128xbf16>, vector<128x128xf32> -> vector<128x128xf32>
    %27 = vector.broadcast %16 : vector<1x128xf32> to vector<128x128xf32>
    %28 = arith.addf %26, %27 : vector<128x128xf32>
    %cst_12 = arith.constant 0.000000e+00 : f32
    %29 = vector.broadcast %cst_12 : f32 to vector<128x128xf32>
    %30 = arith.maximumf %28, %29 : vector<128x128xf32>
    %31 = vector.extract_strided_slice %30 {offsets = [0, 0], sizes = [128, 32], strides = [1, 1]} : vector<128x128xf32> to vector<128x32xf32>
    %32 = arith.truncf %31 : vector<128x32xf32> to vector<128x32xbf16>
    %cst_13 = arith.constant dense<0.000000e+00> : vector<128x128xf32>
    %33 = tpu.matmul %32, %14, %cst_13 {dimension_numbers = #tpu.dot_dimension_numbers<[1], [0], [0], [1], [0, 0, 1, 1], [], []>} : vector<128x32xbf16>, vector<32x128xbf16>, vector<128x128xf32> -> vector<128x128xf32>
    %34 = vector.broadcast %17 : vector<1x128xf32> to vector<128x128xf32>
    %35 = arith.addf %33, %34 : vector<128x128xf32>
    %36 = tpu.iota {dimensions = array<i32: 1>} : vector<128x128xi32>
    %c4_i32 = arith.constant 4 : i32
    %37 = vector.broadcast %c4_i32 : i32 to vector<128x128xi32>
    %38 = arith.cmpi slt, %36, %37 : vector<128x128xi32>
    %cst_14 = arith.constant 0xFF800000 : f32
    %39 = vector.broadcast %cst_14 : f32 to vector<128x128xf32>
    %40 = arith.select %38, %35, %39 : vector<128x128xi1>, vector<128x128xf32>
    %cst_15 = arith.constant dense<0xFF800000> : vector<128xf32>
    %41 = vector.multi_reduction <maximumf>, %40, %cst_15 [1] : vector<128x128xf32> to vector<128xf32>
    %42 = vector.shape_cast %41 : vector<128xf32> to vector<128x1xf32>
    %43 = vector.broadcast %42 : vector<128x1xf32> to vector<128x128xf32>
    %44 = arith.subf %40, %43 : vector<128x128xf32>
    %45 = math.exp %44 : vector<128x128xf32>
    %cst_16 = arith.constant dense<0.000000e+00> : vector<128xf32>
    %46 = vector.multi_reduction <add>, %45, %cst_16 [1] : vector<128x128xf32> to vector<128xf32>
    %47 = vector.shape_cast %46 : vector<128xf32> to vector<128x1xf32>
    %48 = tpu.reciprocal %47 : vector<128x1xf32> -> vector<128x1xf32>
    %49 = vector.broadcast %48 : vector<128x1xf32> to vector<128x128xf32>
    %50 = arith.mulf %45, %49 : vector<128x128xf32>
    %51 = vector.extract_strided_slice %50 {offsets = [0, 0], sizes = [128, 4], strides = [1, 1]} : vector<128x128xf32> to vector<128x4xf32>
    %c0_17 = arith.constant 0 : index
    %c0_18 = arith.constant 0 : index
    %52 = vector.load %arg3[%c0_17, %c0_18] : memref<128x4xf32, #tpu.memory_space<vmem>>, vector<128x4xf32>
    tpu.vector_store %arg3[%c0_17, %c0_18], %51 {strides = array<i32>} : memref<128x4xf32, #tpu.memory_space<vmem>>, vector<128x4xf32>,
    return
  }
  func.func @transform_0(%arg0: i32) -> (i32, i32) {
    %c0_i32 = arith.constant 0 : i32
    %c0_i32_0 = arith.constant 0 : i32
    return %arg0, %c0_i32 : i32, i32
  }
  func.func @transform_1(%arg0: i32) -> (i32, i32) {
    %c0_i32 = arith.constant 0 : i32
    %c0_i32_0 = arith.constant 0 : i32
    %c0_i32_1 = arith.constant 0 : i32
    return %c0_i32, %c0_i32_0 : i32, i32
  }
  func.func @transform_2(%arg0: i32) -> (i32, i32) {
    %c0_i32 = arith.constant 0 : i32
    %c0_i32_0 = arith.constant 0 : i32
    return %arg0, %c0_i32 : i32, i32
  }
}

</mosaic_0001>

<bundles_post_ra>
// kernel: tpu_custom_call.1
= control target key start
LH: loop header
LB: loop body
LE: loop exit
PB: predicated region body
PF: predicated region fallthrough
CT: control target
= control target key end

     0   :  { %s1217_s9 = smov 0   ;;  %s1591_s0 = inlined_call_operand.vmem [shape: f32[256,16], index: 0, kind: input, shape index: {}]   ;;  %s1592_s1 = inlined_call_operand.vmem [shape: f32[88,128], index: 1, kind: input, shape index: {}]   ;;  %s1593_s2 = inlined_call_operand.vmem [shape: f32[256,4], index: 2, kind: output, shape index: {}]  }
   0x1 LB: > { %s963_s10 = sadd.s32 4294967295, %s1200_s9   ;;  %p967_p0 = scmp.ge.s32.totalorder %s1200_s9, 1  ;;  %s1200_s9 = sphi %s1217_s9, %s12_s9  }
   0x2   : > { %p113_p1 = scmp.lt.s32.totalorder %s1200_s9, 3 }
   0x4   : > { %p114_p2 = pnand %p967_p0, %p113_p1 }
   0x5   : > { %s968_s11 = sshll.u32 (!%p114_p2), %s963_s10, 4 }
   0x6   : > { %117 = sbr.rel (%p114_p2) target bundleno = 1135 (0x46f), region = 28  ;;  %p136_p3 = scmp.lt.s32.totalorder (!%p114_p2), %s968_s11, 31 }
   0xb   : > { %s1595_s11 = smov (!%p136_p3, %s968_s11), 31  ;;  %vm180_vm0 = vcmask 130048   ;;  %v277_v48 = vld [vmem:[%s1592_s1] sm:$0xff]  ;;  %v278_v49 = vld [vmem:[%s1592_s1 + $0x8] sm:$0xff]  ;;  %vm456_vm1 = vcmask 261120   ;;  %vm890_vm3 = vcmask 31744  }
   0xc   : > { %s969_s12 = sshll.u32 %s1595_s11, 3  ;;  %v279_v50 = vpack.c.bf16 %v278_v49, %v277_v48  ;;  %v282_v51 = vld [vmem:[%s1592_s1 + $0x20] sm:$0xff]  ;;  %v283_v52 = vld [vmem:[%s1592_s1 + $0x28] sm:$0xff] }
   0xd   : > { %s1233_s15 = scalar_lea.vmem %s1591_s0, %s969_s12  ;;  %v1343_v53 = vpack.c.bf16 %v283_v52, %v282_v51  ;;  %s1538_s19 = scalar_lea.vmem %s1593_s2, %s969_s12 }
   0xe   : > { %v1236_v0 = vld [vmem:[%s1233_s15 + $0x10] sm:$0xff]  ;;  %v1239_v1 = vld [vmem:[%s1233_s15] sm:$0xff]  ;;  %v1242_v2 = vld [vmem:[%s1233_s15 + $0x18] sm:$0xff]  ;;  %1030 = vmatprep.subr.bf16.mxu0 %v279_v50  ;;  %1088 = vmatprep.subr.bf16.mxu1 %v279_v50 }
   0xf   : > { %v166_v3 = vmul.f32 %v1236_v0, %v1236_v0  ;;  %v164_v4 = vmul.f32 %v1239_v1, %v1239_v1  ;;  %v167_v5 = vmul.f32 %v1242_v2, %v1242_v2  ;;  %v1251_v6 = vld [vmem:[%s1233_s15 + $0x8] sm:$0xff]  ;;  %v1259_v9 = vld [vmem:[%s1233_s15 + $0x20] sm:$0xff]  ;;  %v1270_v16 = vld [vmem:[%s1233_s15 + $0x38] sm:$0xff]  ;;  %1031 = vmatpush3.bf16.msra.mxu0 %v279_v50  ;;  %1089 = vmatpush3.bf16.msra.mxu1 %v279_v50 }
  0x10   : > { %v165_v7 = vmul.f32 %v1251_v6, %v1251_v6  ;;  %v1256_v8 = vld [vmem:[%s1233_s15 + $0x28] sm:$0xff]  ;;  %v168_v15 = vmul.f32 %v1259_v9, %v1259_v9  ;;  %v1273_v17 = vld [vmem:[%s1233_s15 + $0x30] sm:$0xff]  ;;  %v171_v20 = vmul.f32 %v1270_v16, %v1270_v16  ;;  %v1285_v23 = vld [vmem:[%s1233_s15 + $0x40] sm:$0xff]  ;;  %1048 = vmatprep.subr.bf16.mxu1 %v1343_v53 }
  0x11   : > { %v187_v10 = vsel %vm180_vm0, %v166_v3, 0.0  ;;  %v181_v11 = vsel %vm180_vm0, %v164_v4, 0.0  ;;  %v190_v12 = vsel %vm180_vm0, %v167_v5, 0.0  ;;  %v169_v14 = vmul.f32 %v1256_v8, %v1256_v8  ;;  %v1282_v22 = vld [vmem:[%s1233_s15 + $0x48] sm:$0xff]  ;;  %v1294_v28 = vld [vmem:[%s1233_s15 + $0x58] sm:$0xff]  ;;  %v1297_v29 = vld [vmem:[%s1233_s15 + $0x50] sm:$0xff] }
  0x12   : > { %188 = vadd.xlane.f32.xlu1 %v187_v10  ;;  %182 = vadd.xlane.f32.xlu0 %v181_v11  ;;  %v184_v13 = vsel %vm180_vm0, %v165_v7, 0.0  ;;  %v193_v19 = vsel %vm180_vm0, %v168_v15, 0.0  ;;  %v170_v21 = vmul.f32 %v1273_v17, %v1273_v17  ;;  %v202_v24 = vsel %vm180_vm0, %v171_v20, 0.0  ;;  %v1306_v34 = vld [vmem:[%s1233_s15 + $0x68] sm:$0xff]  ;;  %v1309_v35 = vld [vmem:[%s1233_s15 + $0x60] sm:$0xff]  ;;  %v1318_v40 = vld [vmem:[%s1233_s15 + $0x78] sm:$0xff] }
  0x13   : > { %v196_v18 = vsel %vm180_vm0, %v169_v14, 0.0  ;;  %v173_v26 = vmul.f32 %v1282_v22, %v1282_v22  ;;  %v172_v27 = vmul.f32 %v1285_v23, %v1285_v23  ;;  %v175_v32 = vmul.f32 %v1294_v28, %v1294_v28  ;;  %v1321_v41 = vld [vmem:[%s1233_s15 + $0x70] sm:$0xff] }
  0x14   : > { %v199_v25 = vsel %vm180_vm0, %v170_v21, 0.0  ;;  %v174_v33 = vmul.f32 %v1297_v29, %v1297_v29  ;;  %v177_v38 = vmul.f32 %v1306_v34, %v1306_v34  ;;  %v176_v39 = vmul.f32 %v1309_v35, %v1309_v35 }
  0x15   : > { %v208_v30 = vsel %vm180_vm0, %v173_v26, 0.0  ;;  %v205_v31 = vsel %vm180_vm0, %v172_v27, 0.0  ;;  %v214_v36 = vsel %vm180_vm0, %v175_v32, 0.0  ;;  %v179_v44 = vmul.f32 %v1318_v40, %v1318_v40 }
  0x16   : > { %191 = vadd.xlane.f32.xlu1 %v190_v12  ;;  %185 = vadd.xlane.f32.xlu0 %v184_v13  ;;  %v211_v37 = vsel %vm180_vm0, %v174_v33, 0.0  ;;  %v220_v42 = vsel %vm180_vm0, %v177_v38, 0.0  ;;  %v217_v43 = vsel %vm180_vm0, %v176_v39, 0.0  ;;  %v178_v45 = vmul.f32 %v1321_v41, %v1321_v41 }
  0x17   : > { %v226_v46 = vsel %vm180_vm0, %v179_v44, 0.0 }
  0x18   : > { %v223_v47 = vsel %vm180_vm0, %v178_v45, 0.0 }
  0x1a   : > { %197 = vadd.xlane.f32.xlu1 %v196_v18  ;;  %194 = vadd.xlane.f32.xlu0 %v193_v19 }
  0x1e   : > { %203 = vadd.xlane.f32.xlu1 %v202_v24  ;;  %200 = vadd.xlane.f32.xlu0 %v199_v25 }
  0x22   : > { %209 = vadd.xlane.f32.xlu1 %v208_v30  ;;  %206 = vadd.xlane.f32.xlu0 %v205_v31 }
  0x26   : > { %215 = vadd.xlane.f32.xlu1 %v214_v36  ;;  %212 = vadd.xlane.f32.xlu0 %v211_v37 }
  0x2a   : > { %221 = vadd.xlane.f32.xlu1 %v220_v42  ;;  %218 = vadd.xlane.f32.xlu0 %v217_v43 }
  0x2e   : > { %227 = vadd.xlane.f32.xlu1 %v226_v46  ;;  %224 = vadd.xlane.f32.xlu0 %v223_v47 }
  0x9b   : > { %v189_v54 = vpop.xlane.xlu1 %188  ;;  %v183_v55 = vpop.xlane.xlu0 %182 }
  0x9c   : > { %v231_v56 = vmax.f32 %v189_v54, 1e-24  ;;  %v229_v57 = vmax.f32 %v183_v55, 1e-24 }
  0x9e   : > { %1098 = vrsqrt.f32 %v231_v56 }
  0x9f   : > { %v192_v58 = vpop.xlane.xlu1 %191  ;;  %v186_v59 = vpop.xlane.xlu0 %185  ;;  %1100 = vrsqrt.f32 %v229_v57 }
  0xa0   : > { %v232_v60 = vmax.f32 %v192_v58, 1e-24  ;;  %v230_v61 = vmax.f32 %v186_v59, 1e-24 }
  0xa2   : > { %1102 = vrsqrt.f32 %v232_v60 }
  0xa3   : > { %1104 = vrsqrt.f32 %v230_v61  ;;  %v198_v62 = vpop.xlane.xlu1 %197  ;;  %v195_v63 = vpop.xlane.xlu0 %194 }
  0xa4   : > { %v234_v3 = vmax.f32 %v198_v62, 1e-24  ;;  %v233_v4 = vmax.f32 %v195_v63, 1e-24 }
  0xa6   : > { %1106 = vrsqrt.f32 %v234_v3 }
  0xa7   : > { %1108 = vrsqrt.f32 %v233_v4  ;;  %v204_v5 = vpop.xlane.xlu1 %203  ;;  %v201_v7 = vpop.xlane.xlu0 %200 }
  0xa8   : > { %v236_v10 = vmax.f32 %v204_v5, 1e-24  ;;  %v235_v11 = vmax.f32 %v201_v7, 1e-24 }
  0xaa   : > { %1110 = vrsqrt.f32 %v236_v10 }
  0xab   : > { %1112 = vrsqrt.f32 %v235_v11  ;;  %v210_v12 = vpop.xlane.xlu1 %209  ;;  %v207_v13 = vpop.xlane.xlu0 %206 }
  0xac   : > { %v238_v14 = vmax.f32 %v210_v12, 1e-24  ;;  %v237_v15 = vmax.f32 %v207_v13, 1e-24  ;;  %v1099_v18 = vpop.eup %1098  ;;  %v972_v12 = vld [vmem:[%s1592_s1 + $0x50] ss:$0 sm:$0xff] }
  0xad   : > { %v1101_v19 = vpop.eup %1100  ;;  %v263_v30 = vmul.f32 %v1099_v18, %v1236_v0 }
  0xae   : > { %1114 = vrsqrt.f32 %v238_v14  ;;  %v261_v32 = vmul.f32 %v1101_v19, %v1239_v1 }
  0xaf   : > { %v1103_v20 = vpop.eup %1102  ;;  %1116 = vrsqrt.f32 %v237_v15  ;;  %v216_v21 = vpop.xlane.xlu1 %215 }
  0xb0   : > { %v213_v24 = vpop.xlane.xlu0 %212  ;;  %v1105_v25 = vpop.eup %1104  ;;  %v240_v26 = vmax.f32 %v216_v21, 1e-24  ;;  %v264_v31 = vmul.f32 %v1103_v20, %v1242_v2 }
  0xb1   : > { %v239_v27 = vmax.f32 %v213_v24, 1e-24  ;;  %v262_v33 = vmul.f32 %v1105_v25, %v1251_v6 }
  0xb2   : > { %1118 = vrsqrt.f32 %v240_v26  ;;  %v296_v36 = vpack.c.bf16 %v264_v31, %v263_v30 }
  0xb3   : > { %v1107_v37 = vpop.eup %1106  ;;  %1120 = vrsqrt.f32 %v239_v27  ;;  %v222_v38 = vpop.xlane.xlu1 %221  ;;  %v295_v42 = vpack.c.bf16 %v262_v33, %v261_v32 }
  0xb4   : > { %v219_v39 = vpop.xlane.xlu0 %218  ;;  %v1109_v43 = vpop.eup %1108  ;;  %v242_v44 = vmax.f32 %v222_v38, 1e-24  ;;  %v266_v46 = vmul.f32 %v1107_v37, %v1256_v8 }
  0xb5   : > { %v241_v45 = vmax.f32 %v219_v39, 1e-24  ;;  %1032 = vmatprep.mubr.msk.bf16.mxu0 %vm180_vm0, %v295_v42  ;;  %v265_v0 = vmul.f32 %v1109_v43, %v1259_v9 }
  0xb6   : > { %1122 = vrsqrt.f32 %v242_v44  ;;  %1033 = vmatmul.mubr.msk.bf16.vlgmr.msra.gmra.mxu0 %vm180_vm0, %v296_v36 }
  0xb7   : > { %v1111_v1 = vpop.eup %1110  ;;  %1124 = vrsqrt.f32 %v241_v45  ;;  %v228_v2 = vpop.xlane.xlu1 %227  ;;  %v297_v47 = vpack.c.bf16 %v266_v46, %v265_v0 }
  0xb8   : > { %v225_v6 = vpop.xlane.xlu0 %224  ;;  %v1113_v48 = vpop.eup %1112  ;;  %v244_v49 = vmax.f32 %v228_v2, 1e-24  ;;  %v268_v51 = vmul.f32 %v1111_v1, %v1270_v16 }
  0xb9   : > { %v243_v50 = vmax.f32 %v225_v6, 1e-24  ;;  %1036 = vmatprep.mubr.msk.bf16.mxu0 %vm180_vm0, %v297_v47  ;;  %v267_v8 = vmul.f32 %v1113_v48, %v1273_v17 }
  0xba   : > { %1126 = vrsqrt.f32 %v244_v49 }
  0xbb   : > { %v1115_v52 = vpop.eup %1114  ;;  %1128 = vrsqrt.f32 %v243_v50  ;;  %v298_v9 = vpack.c.bf16 %v268_v51, %v267_v8 }
  0xbc   : > { %v1117_v54 = vpop.eup %1116  ;;  %v270_v55 = vmul.f32 %v1115_v52, %v1282_v22 }
  0xbd   : > { %v269_v56 = vmul.f32 %v1117_v54, %v1285_v23 }
  0xbe   : > { %1037 = vmatmul.mubr.msk.bf16.gmra.mxu0 %vm180_vm0, %v298_v9 }
  0xbf   : > { %v1119_v57 = vpop.eup %1118  ;;  %v299_v58 = vpack.c.bf16 %v270_v55, %v269_v56 }
  0xc0   : > { %v1121_v59 = vpop.eup %1120  ;;  %v272_v16 = vmul.f32 %v1119_v57, %v1294_v28 }
  0xc1   : > { %1040 = vmatprep.mubr.msk.bf16.mxu1 %vm180_vm0, %v299_v58  ;;  %v271_v17 = vmul.f32 %v1121_v59, %v1297_v29 }
  0xc3   : > { %v1123_v60 = vpop.eup %1122  ;;  %v300_v61 = vpack.c.bf16 %v272_v16, %v271_v17 }
  0xc4   : > { %v1125_v62 = vpop.eup %1124  ;;  %v274_v63 = vmul.f32 %v1123_v60, %v1306_v34  ;;  %v280_v34 = vld [vmem:[%s1592_s1 + $0x10] sm:$0xff] }
  0xc5   : > { %1041 = vmatmul.mubr.msk.bf16.vlgmr.msra.gmra.mxu1 %vm180_vm0, %v300_v61  ;;  %v273_v22 = vmul.f32 %v1125_v62, %v1309_v35  ;;  %v281_v35 = vld [vmem:[%s1592_s1 + $0x18] sm:$0xff] }
  0xc6   : > { %1049 = vmatpush3.bf16.msra.mxu1 %v1343_v53  ;;  %v284_v53 = vpack.c.bf16 %v281_v35, %v280_v34  ;;  %v287_v34 = vld [vmem:[%s1592_s1 + $0x38] sm:$0xff] }
  0xc7   : > { %v1127_v23 = vpop.eup %1126  ;;  %v301_v3 = vpack.c.bf16 %v274_v63, %v273_v22 }
  0xc8   : > { %v1129_v4 = vpop.eup %1128  ;;  %v276_v28 = vmul.f32 %v1127_v23, %v1318_v40  ;;  %1050 = vmatprep.subr.bf16.mxu1 %v284_v53  ;;  %v288_v40 = vld [vmem:[%s1592_s1 + $0x40] sm:$0xff] }
  0xc9   : > { %1044 = vmatprep.mubr.msk.bf16.mxu1 %vm180_vm0, %v301_v3  ;;  %v275_v29 = vmul.f32 %v1129_v4, %v1321_v41  ;;  %v289_v41 = vld [vmem:[%s1592_s1 + $0x48] sm:$0xff] }
  0xca   : > { %1051 = vmatpush3.bf16.msra.mxu1 %v284_v53  ;;  %v291_v7 = vpack.c.bf16 %v289_v41, %v288_v40  ;;  %v981_v41 = vld [vmem:[%s1592_s1 + $0x51] ss:$0 sm:$0xff] }
  0xcb   : > { %v302_v5 = vpack.c.bf16 %v276_v28, %v275_v29 }
  0xcc   : > { %1068 = vmatprep.subr.bf16.mxu0 %v291_v7 }
  0xcd   : > { %1045 = vmatmul.mubr.msk.bf16.gmra.mxu1 %vm180_vm0, %v302_v5  ;;  %1069 = vmatpush3.bf16.msra.mxu0 %v291_v7  ;;  %v286_v5 = vld [vmem:[%s1592_s1 + $0x30] sm:$0xff] }
  0xce   : > { %v290_v35 = vpack.c.bf16 %v287_v34, %v286_v5 }
  0xd0   : > { %1070 = vmatprep.subr.bf16.mxu0 %v290_v35 }
  0xd1   : > { %1071 = vmatpush3.bf16.msra.mxu0 %v290_v35 }
 0x176   : > { %v1034_v10 = vpop.f32.mrf.mxu0 }
 0x177   : > { %v374_v18 = vadd.f32 %v1034_v10, %v972_v12 }
 0x178   : > { %v365_v11 = vpop.f32.mrf.mxu0 }
 0x179   : > { %v366_v14 = vadd.f32 %v972_v12, %v365_v11  ;;  %v430_v27 = vmax.f32 %v374_v18, 0.0 }
 0x17a   : > { %v1035_v13 = vpop.f32.mrf.mxu0 }
 0x17b   : > { %v377_v15 = vadd.f32 %v1035_v13, %v972_v12  ;;  %v428_v25 = vmax.f32 %v366_v14, 0.0 }
 0x17c   : > { %v368_v19 = vpop.f32.mrf.mxu0 }
 0x17d   : > { %v369_v20 = vadd.f32 %v972_v12, %v368_v19  ;;  %v431_v21 = vmax.f32 %v377_v15, 0.0 }
 0x17e   : > { %v1038_v24 = vpop.f32.mrf.mxu0 }
 0x17f   : > { %v429_v26 = vmax.f32 %v369_v20, 0.0  ;;  %v445_v32 = vpack.c.bf16 %v431_v21, %v430_v27  ;;  %v390_v38 = vadd.f32 %v1038_v24, %v972_v12 }
 0x180   : > { %v381_v30 = vpop.f32.mrf.mxu0 }
 0x181   : > { %v444_v31 = vpack.c.bf16 %v429_v26, %v428_v25  ;;  %v382_v36 = vadd.f32 %v972_v12, %v381_v30  ;;  %v434_v1 = vmax.f32 %v390_v38, 0.0 }
 0x182   : > { %v1039_v33 = vpop.f32.mrf.mxu0 }
 0x183   : > { %v393_v37 = vadd.f32 %v1039_v33, %v972_v12  ;;  %1052 = vmatprep.mubr.msk.bf16.mxu1 %vm456_vm1, %v444_v31  ;;  %v432_v45 = vmax.f32 %v382_v36, 0.0 }
 0x184   : > { %v384_v39 = vpop.f32.mrf.mxu0  ;;  %1053 = vmatmul.mubr.msk.bf16.vlgmr.msra.gmra.mxu1 %vm456_vm1, %v445_v32 }
 0x185   : > { %v385_v42 = vadd.f32 %v972_v12, %v384_v39  ;;  %v1042_v43 = vpop.f32.mrf.mxu1  ;;  %v435_v44 = vmax.f32 %v393_v37, 0.0 }
 0x186   : > { %v406_v51 = vadd.f32 %v1042_v43, %v972_v12 }
 0x187   : > { %v433_v46 = vmax.f32 %v385_v42, 0.0  ;;  %v397_v0 = vpop.f32.mrf.mxu1  ;;  %v447_v47 = vpack.c.bf16 %v435_v44, %v434_v1 }
 0x188   : > { %v398_v48 = vadd.f32 %v972_v12, %v397_v0  ;;  %v438_v57 = vmax.f32 %v406_v51, 0.0 }
 0x189   : > { %v446_v2 = vpack.c.bf16 %v433_v46, %v432_v45  ;;  %v1043_v6 = vpop.f32.mrf.mxu1 }
 0x18a   : > { %v409_v49 = vadd.f32 %v1043_v6, %v972_v12  ;;  %v436_v9 = vmax.f32 %v398_v48, 0.0 }
 0x18b   : > { %v400_v50 = vpop.f32.mrf.mxu1  ;;  %1056 = vmatprep.mubr.msk.bf16.mxu1 %vm456_vm1, %v446_v2 }
 0x18c   : > { %v401_v8 = vadd.f32 %v972_v12, %v400_v50  ;;  %1057 = vmatmul.mubr.msk.bf16.gmra.mxu1 %vm456_vm1, %v447_v47  ;;  %v439_v54 = vmax.f32 %v409_v49, 0.0 }
 0x18d   : > { %v1046_v52 = vpop.f32.mrf.mxu1 }
 0x18e   : > { %v437_v55 = vmax.f32 %v401_v8, 0.0  ;;  %v449_v16 = vpack.c.bf16 %v439_v54, %v438_v57  ;;  %v422_v62 = vadd.f32 %v1046_v52, %v972_v12 }
 0x18f   : > { %v413_v56 = vpop.f32.mrf.mxu1 }
 0x190   : > { %v448_v58 = vpack.c.bf16 %v437_v55, %v436_v9  ;;  %v414_v17 = vadd.f32 %v972_v12, %v413_v56  ;;  %v442_v4 = vmax.f32 %v422_v62, 0.0 }
 0x191   : > { %v1047_v59 = vpop.f32.mrf.mxu1 }
 0x192   : > { %v425_v60 = vadd.f32 %v1047_v59, %v972_v12  ;;  %1060 = vmatprep.mubr.msk.bf16.mxu1 %vm456_vm1, %v448_v58  ;;  %v440_v22 = vmax.f32 %v414_v17, 0.0 }
 0x193   : > { %v416_v61 = vpop.f32.mrf.mxu1 }
 0x194   : > { %v417_v63 = vadd.f32 %v972_v12, %v416_v61  ;;  %1061 = vmatmul.mubr.msk.bf16.gmra.mxu1 %vm456_vm1, %v449_v16  ;;  %v443_v23 = vmax.f32 %v425_v60, 0.0 }
 0x196   : > { %v441_v3 = vmax.f32 %v417_v63, 0.0  ;;  %v451_v29 = vpack.c.bf16 %v443_v23, %v442_v4 }
 0x198   : > { %v450_v28 = vpack.c.bf16 %v441_v3, %v440_v22  ;;  %v727_v3 = vlaneseq }
 0x19a   : > { %1064 = vmatprep.mubr.msk.bf16.mxu1 %vm456_vm1, %v450_v28  ;;  %v1411_v4 = vand.u32 127, %v727_v3  ;;  %v990_v28 = vld [vmem:[%s1592_s1 + $0x52] ss:$0 sm:$0xff] }
 0x19c   : > { %1065 = vmatmul.mubr.msk.bf16.gmra.mxu1 %vm456_vm1, %v451_v29  ;;  %vm729_vm2 = vcmp.lt.s32.totalorder %v1411_v4, 4 }
 0x244   : > { %v1054_v53 = vpop.f32.mrf.mxu1 }
 0x245   : > { %v524_v12 = vadd.f32 %v1054_v53, %v981_v41 }
 0x246   : > { %v515_v40 = vpop.f32.mrf.mxu1 }
 0x247   : > { %v516_v10 = vadd.f32 %v981_v41, %v515_v40  ;;  %v580_v21 = vmax.f32 %v524_v12, 0.0 }
 0x248   : > { %v1055_v7 = vpop.f32.mrf.mxu1 }
 0x249   : > { %v527_v11 = vadd.f32 %v1055_v7, %v981_v41  ;;  %v578_v19 = vmax.f32 %v516_v10, 0.0 }
 0x24a   : > { %v518_v13 = vpop.f32.mrf.mxu1 }
 0x24b   : > { %v519_v14 = vadd.f32 %v981_v41, %v518_v13  ;;  %v581_v15 = vmax.f32 %v527_v11, 0.0 }
 0x24c   : > { %v1058_v18 = vpop.f32.mrf.mxu1 }
 0x24d   : > { %v579_v20 = vmax.f32 %v519_v14, 0.0  ;;  %v595_v26 = vpack.c.bf16 %v581_v15, %v580_v21  ;;  %v540_v32 = vadd.f32 %v1058_v18, %v981_v41 }
 0x24e   : > { %v531_v24 = vpop.f32.mrf.mxu1 }
 0x24f   : > { %v594_v25 = vpack.c.bf16 %v579_v20, %v578_v19  ;;  %v532_v30 = vadd.f32 %v981_v41, %v531_v24  ;;  %v584_v43 = vmax.f32 %v540_v32, 0.0 }
 0x250   : > { %v1059_v27 = vpop.f32.mrf.mxu1 }
 0x251   : > { %v543_v31 = vadd.f32 %v1059_v27, %v981_v41  ;;  %1072 = vmatprep.mubr.msk.bf16.mxu0 %vm456_vm1, %v594_v25  ;;  %v582_v39 = vmax.f32 %v532_v30, 0.0 }
 0x252   : > { %v534_v33 = vpop.f32.mrf.mxu1  ;;  %1073 = vmatmul.mubr.msk.bf16.vlgmr.msra.gmra.mxu0 %vm456_vm1, %v595_v26 }
 0x253   : > { %v535_v36 = vadd.f32 %v981_v41, %v534_v33  ;;  %v585_v37 = vmax.f32 %v543_v31, 0.0 }
 0x254   : > { %v1062_v38 = vpop.f32.mrf.mxu1 }
 0x255   : > { %v583_v42 = vmax.f32 %v535_v36, 0.0  ;;  %v597_v46 = vpack.c.bf16 %v585_v37, %v584_v43  ;;  %v556_v6 = vadd.f32 %v1062_v38, %v981_v41 }
 0x256   : > { %v547_v44 = vpop.f32.mrf.mxu1 }
 0x257   : > { %v596_v45 = vpack.c.bf16 %v583_v42, %v582_v39  ;;  %v548_v1 = vadd.f32 %v981_v41, %v547_v44  ;;  %v588_v52 = vmax.f32 %v556_v6, 0.0 }
 0x258   : > { %v1063_v0 = vpop.f32.mrf.mxu1 }
 0x259   : > { %v559_v2 = vadd.f32 %v1063_v0, %v981_v41  ;;  %1076 = vmatprep.mubr.msk.bf16.mxu0 %vm456_vm1, %v596_v45  ;;  %v586_v51 = vmax.f32 %v548_v1, 0.0 }
 0x25a   : > { %v550_v47 = vpop.f32.mrf.mxu1  ;;  %1077 = vmatmul.mubr.msk.bf16.gmra.mxu0 %vm456_vm1, %v597_v46 }
 0x25b   : > { %v551_v48 = vadd.f32 %v981_v41, %v550_v47  ;;  %v589_v49 = vmax.f32 %v559_v2, 0.0 }
 0x25c   : > { %v1066_v50 = vpop.f32.mrf.mxu1 }
 0x25d   : > { %v587_v8 = vmax.f32 %v551_v48, 0.0  ;;  %v599_v55 = vpack.c.bf16 %v589_v49, %v588_v52  ;;  %v572_v59 = vadd.f32 %v1066_v50, %v981_v41 }
 0x25e   : > { %v563_v9 = vpop.f32.mrf.mxu1 }
 0x25f   : > { %v598_v54 = vpack.c.bf16 %v587_v8, %v586_v51  ;;  %v564_v57 = vadd.f32 %v981_v41, %v563_v9  ;;  %v592_v63 = vmax.f32 %v572_v59, 0.0 }
 0x260   : > { %v1067_v56 = vpop.f32.mrf.mxu1 }
 0x261   : > { %v575_v58 = vadd.f32 %v1067_v56, %v981_v41  ;;  %1080 = vmatprep.mubr.msk.bf16.mxu0 %vm456_vm1, %v598_v54  ;;  %v590_v61 = vmax.f32 %v564_v57, 0.0 }
 0x262   : > { %v566_v16 = vpop.f32.mrf.mxu1  ;;  %1081 = vmatmul.mubr.msk.bf16.gmra.mxu0 %vm456_vm1, %v599_v55 }
 0x263   : > { %v567_v17 = vadd.f32 %v981_v41, %v566_v16  ;;  %v593_v60 = vmax.f32 %v575_v58, 0.0 }
 0x265   : > { %v591_v62 = vmax.f32 %v567_v17, 0.0  ;;  %v601_v23 = vpack.c.bf16 %v593_v60, %v592_v63 }
 0x267   : > { %v600_v22 = vpack.c.bf16 %v591_v62, %v590_v61 }
 0x269   : > { %1084 = vmatprep.mubr.msk.bf16.mxu0 %vm456_vm1, %v600_v22 }
 0x26a   : > { %1085 = vmatmul.mubr.msk.bf16.gmra.mxu0 %vm456_vm1, %v601_v23 }
 0x312   : > { %v1074_v29 = vpop.f32.mrf.mxu0 }
 0x313   : > { %v673_v5 = vadd.f32 %v1074_v29, %v990_v28 }
 0x314   : > { %v664_v34 = vpop.f32.mrf.mxu0 }
 0x315   : > { %v665_v35 = vadd.f32 %v990_v28, %v664_v34  ;;  %v732_v53 = vsel %vm729_vm2, %v673_v5, -inf }
 0x316   : > { %750 = vmax.xlane.f32.xlu0 %v732_v53  ;;  %v1075_v40 = vpop.f32.mrf.mxu0 }
 0x317   : > { %v676_v41 = vadd.f32 %v1075_v40, %v990_v28  ;;  %v730_v12 = vsel %vm729_vm2, %v665_v35, -inf }
 0x318   : > { %v667_v7 = vpop.f32.mrf.mxu0 }
 0x319   : > { %v668_v10 = vadd.f32 %v990_v28, %v667_v7  ;;  %v733_v11 = vsel %vm729_vm2, %v676_v41, -inf }
 0x31a   : > { %752 = vmax.xlane.f32.xlu1 %v733_v11  ;;  %v1078_v13 = vpop.f32.mrf.mxu0  ;;  %746 = vmax.xlane.f32.xlu0 %v730_v12 }
 0x31b   : > { %v689_v14 = vadd.f32 %v1078_v13, %v990_v28  ;;  %v731_v19 = vsel %vm729_vm2, %v668_v10, -inf }
 0x31c   : > { %v680_v15 = vpop.f32.mrf.mxu0 }
 0x31d   : > { %v681_v18 = vadd.f32 %v990_v28, %v680_v15  ;;  %v736_v20 = vsel %vm729_vm2, %v689_v14, -inf }
 0x31e   : > { %v1079_v21 = vpop.f32.mrf.mxu0  ;;  %748 = vmax.xlane.f32.xlu1 %v731_v19  ;;  %758 = vmax.xlane.f32.xlu0 %v736_v20 }
 0x31f   : > { %v692_v24 = vadd.f32 %v1079_v21, %v990_v28  ;;  %v734_v30 = vsel %vm729_vm2, %v681_v18, -inf }
 0x320   : > { %v683_v25 = vpop.f32.mrf.mxu0 }
 0x321   : > { %v684_v26 = vadd.f32 %v990_v28, %v683_v25  ;;  %v737_v27 = vsel %vm729_vm2, %v692_v24, -inf }
 0x322   : > { %v1082_v31 = vpop.f32.mrf.mxu0  ;;  %760 = vmax.xlane.f32.xlu1 %v737_v27  ;;  %754 = vmax.xlane.f32.xlu0 %v734_v30 }
 0x323   : > { %v705_v32 = vadd.f32 %v1082_v31, %v990_v28  ;;  %v1433_v37 = vsel %vm729_vm2, %v684_v26, -inf }
 0x324   : > { %v696_v33 = vpop.f32.mrf.mxu0 }
 0x325   : > { %v697_v36 = vadd.f32 %v990_v28, %v696_v33  ;;  %v1437_v38 = vsel %vm729_vm2, %v705_v32, -inf }
 0x326   : > { %v1083_v39 = vpop.f32.mrf.mxu0  ;;  %756 = vmax.xlane.f32.xlu1 %v1433_v37  ;;  %766 = vmax.xlane.f32.xlu0 %v1437_v38 }
 0x327   : > { %v708_v42 = vadd.f32 %v1083_v39, %v990_v28  ;;  %v1447_v46 = vsel %vm729_vm2, %v697_v36, -inf }
 0x328   : > { %v699_v43 = vpop.f32.mrf.mxu0 }
 0x329   : > { %v700_v44 = vadd.f32 %v990_v28, %v699_v43  ;;  %v1443_v45 = vsel %vm729_vm2, %v708_v42, -inf }
 0x32a   : > { %768 = vmax.xlane.f32.xlu1 %v1443_v45  ;;  %762 = vmax.xlane.f32.xlu0 %v1447_v46  ;;  %v1086_v0 = vpop.f32.mrf.mxu0 }
 0x32b   : > { %v1453_v6 = vsel %vm729_vm2, %v700_v44, -inf  ;;  %v721_v48 = vadd.f32 %v1086_v0, %v990_v28 }
 0x32c   : > { %v712_v1 = vpop.f32.mrf.mxu0 }
 0x32d   : > { %v713_v2 = vadd.f32 %v990_v28, %v712_v1  ;;  %v1467_v9 = vsel %vm729_vm2, %v721_v48, -inf }
 0x32e   : > { %764 = vmax.xlane.f32.xlu1 %v1453_v6  ;;  %v1087_v47 = vpop.f32.mrf.mxu0 }
 0x32f   : > { %v1458_v49 = vsel %vm729_vm2, %v713_v2, -inf  ;;  %v724_v8 = vadd.f32 %v1087_v47, %v990_v28 }
 0x330   : > { %v715_v50 = vpop.f32.mrf.mxu0  ;;  %770 = vmax.xlane.f32.xlu0 %v1458_v49 }
 0x331   : > { %v716_v51 = vadd.f32 %v990_v28, %v715_v50  ;;  %v1473_v54 = vsel %vm729_vm2, %v724_v8, -inf }
 0x333   : > { %v1463_v52 = vsel %vm729_vm2, %v716_v51, -inf }
 0x334   : > { %772 = vmax.xlane.f32.xlu1 %v1463_v52  ;;  %774 = vmax.xlane.f32.xlu0 %v1467_v9 }
 0x338   : > { %776 = vmax.xlane.f32.xlu1 %v1473_v54 }
 0x39f   : > { %v751_v55 = vpop.xlane.xlu0 %750 }
 0x3a0   : > { %v780_v56 = vsub.f32 %v732_v53, %v751_v55 }
 0x3a2   : > { %v798_v57 = vmul.f32 1.442695, %v780_v56 }
 0x3a3   : > { %v753_v58 = vpop.xlane.xlu1 %752  ;;  %v747_v59 = vpop.xlane.xlu0 %746 }
 0x3a4   : > { %1130 = vpow2.f32 %v798_v57  ;;  %v781_v16 = vsub.f32 %v733_v11, %v753_v58  ;;  %v778_v17 = vsub.f32 %v730_v12, %v747_v59 }
 0x3a6   : > { %v800_v60 = vmul.f32 1.442695, %v781_v16  ;;  %v794_v61 = vmul.f32 1.442695, %v778_v17 }
 0x3a7   : > { %v749_v62 = vpop.xlane.xlu1 %748  ;;  %v759_v63 = vpop.xlane.xlu0 %758 }
 0x3a8   : > { %1132 = vpow2.f32 %v800_v60  ;;  %v779_v22 = vsub.f32 %v731_v19, %v749_v62  ;;  %v784_v23 = vsub.f32 %v736_v20, %v759_v63 }
 0x3a9   : > { %1134 = vpow2.f32 %v794_v61 }
 0x3aa   : > { %v796_v3 = vmul.f32 1.442695, %v779_v22  ;;  %v806_v4 = vmul.f32 1.442695, %v784_v23 }
 0x3ab   : > { %v761_v28 = vpop.xlane.xlu1 %760  ;;  %v755_v29 = vpop.xlane.xlu0 %754 }
 0x3ac   : > { %1136 = vpow2.f32 %v796_v3  ;;  %v785_v5 = vsub.f32 %v737_v27, %v761_v28  ;;  %v782_v34 = vsub.f32 %v734_v30, %v755_v29 }
 0x3ad   : > { %1138 = vpow2.f32 %v806_v4 }
 0x3ae   : > { %v808_v35 = vmul.f32 1.442695, %v785_v5  ;;  %v802_v53 = vmul.f32 1.442695, %v782_v34 }
 0x3af   : > { %v757_v40 = vpop.xlane.xlu1 %756  ;;  %v767_v41 = vpop.xlane.xlu0 %766 }
 0x3b0   : > { %1140 = vpow2.f32 %v808_v35  ;;  %v783_v7 = vsub.f32 %v1433_v37, %v757_v40  ;;  %v788_v10 = vsub.f32 %v1437_v38, %v767_v41 }
 0x3b1   : > { %v1478_v11 = vpop.eup %1130  ;;  %1142 = vpow2.f32 %v802_v53 }
 0x3b2   : > { %v804_v12 = vmul.f32 1.442695, %v783_v7  ;;  %v814_v13 = vmul.f32 1.442695, %v788_v10  ;;  %830 = vadd.xlane.f32.xlu0 %v1478_v11 }
 0x3b3   : > { %v769_v14 = vpop.xlane.xlu1 %768  ;;  %v763_v15 = vpop.xlane.xlu0 %762 }
 0x3b4   : > { %1144 = vpow2.f32 %v804_v12  ;;  %v789_v18 = vsub.f32 %v1443_v45, %v769_v14  ;;  %v786_v19 = vsub.f32 %v1447_v46, %v763_v15 }
 0x3b5   : > { %v1483_v20 = vpop.eup %1132  ;;  %1146 = vpow2.f32 %v814_v13 }
 0x3b6   : > { %v1485_v21 = vpop.eup %1134  ;;  %v816_v24 = vmul.f32 1.442695, %v789_v18  ;;  %v810_v25 = vmul.f32 1.442695, %v786_v19  ;;  %832 = vadd.xlane.f32.xlu1 %v1483_v20 }
 0x3b7   : > { %826 = vadd.xlane.f32.xlu0 %v1485_v21  ;;  %v765_v26 = vpop.xlane.xlu1 %764 }
 0x3b8   : > { %1148 = vpow2.f32 %v816_v24  ;;  %v787_v27 = vsub.f32 %v1453_v6, %v765_v26 }
 0x3b9   : > { %v1490_v30 = vpop.eup %1136  ;;  %1150 = vpow2.f32 %v810_v25  ;;  %v771_v31 = vpop.xlane.xlu0 %770 }
 0x3ba   : > { %v1492_v32 = vpop.eup %1138  ;;  %v812_v33 = vmul.f32 1.442695, %v787_v27  ;;  %v790_v36 = vsub.f32 %v1458_v49, %v771_v31  ;;  %828 = vadd.xlane.f32.xlu1 %v1490_v30 }
 0x3bb   : > { %838 = vadd.xlane.f32.xlu0 %v1492_v32 }
 0x3bc   : > { %1152 = vpow2.f32 %v812_v33  ;;  %v818_v37 = vmul.f32 1.442695, %v790_v36 }
 0x3bd   : > { %v1497_v38 = vpop.eup %1140  ;;  %v773_v39 = vpop.xlane.xlu1 %772 }
 0x3be   : > { %v775_v42 = vpop.xlane.xlu0 %774  ;;  %v1499_v43 = vpop.eup %1142  ;;  %1154 = vpow2.f32 %v818_v37  ;;  %v791_v44 = vsub.f32 %v1463_v52, %v773_v39  ;;  %840 = vadd.xlane.f32.xlu1 %v1497_v38 }
 0x3bf   : > { %v792_v45 = vsub.f32 %v1467_v9, %v775_v42  ;;  %834 = vadd.xlane.f32.xlu0 %v1499_v43 }
 0x3c0   : > { %v820_v46 = vmul.f32 1.442695, %v791_v44 }
 0x3c1   : > { %v822_v0 = vmul.f32 1.442695, %v792_v45  ;;  %v1505_v1 = vpop.eup %1144  ;;  %v777_v2 = vpop.xlane.xlu1 %776 }
 0x3c2   : > { %v1507_v6 = vpop.eup %1146  ;;  %1156 = vpow2.f32 %v820_v46  ;;  %v793_v47 = vsub.f32 %v1473_v54, %v777_v2  ;;  %836 = vadd.xlane.f32.xlu1 %v1505_v1 }
 0x3c3   : > { %1158 = vpow2.f32 %v822_v0  ;;  %846 = vadd.xlane.f32.xlu0 %v1507_v6 }
 0x3c4   : > { %v824_v48 = vmul.f32 1.442695, %v793_v47 }
 0x3c5   : > { %v1512_v49 = vpop.eup %1148 }
 0x3c6   : > { %v1514_v50 = vpop.eup %1150  ;;  %1160 = vpow2.f32 %v824_v48  ;;  %848 = vadd.xlane.f32.xlu1 %v1512_v49 }
 0x3c7   : > { %842 = vadd.xlane.f32.xlu0 %v1514_v50 }
 0x3c9   : > { %v1518_v51 = vpop.eup %1152 }
 0x3ca   : > { %844 = vadd.xlane.f32.xlu1 %v1518_v51 }
 0x3cb   : > { %v1521_v8 = vpop.eup %1154 }
 0x3cc   : > { %850 = vadd.xlane.f32.xlu0 %v1521_v8 }
 0x3cf   : > { %v1524_v52 = vpop.eup %1156 }
 0x3d0   : > { %v1526_v9 = vpop.eup %1158  ;;  %852 = vadd.xlane.f32.xlu1 %v1524_v52 }
 0x3d1   : > { %854 = vadd.xlane.f32.xlu0 %v1526_v9 }
 0x3d3   : > { %v1530_v54 = vpop.eup %1160 }
 0x3d4   : > { %856 = vadd.xlane.f32.xlu1 %v1530_v54 }
 0x43b   : > { %v831_v55 = vpop.xlane.xlu0 %830 }
 0x43c   : > { %1162 = vrcp.f32 %v831_v55 }
 0x43f   : > { %v833_v56 = vpop.xlane.xlu1 %832 }
 0x440   : > { %1164 = vrcp.f32 %v833_v56  ;;  %v827_v57 = vpop.xlane.xlu0 %826 }
 0x441   : > { %1166 = vrcp.f32 %v827_v57 }
 0x443   : > { %v829_v58 = vpop.xlane.xlu1 %828 }
 0x444   : > { %1168 = vrcp.f32 %v829_v58  ;;  %v839_v59 = vpop.xlane.xlu0 %838 }
 0x445   : > { %1170 = vrcp.f32 %v839_v59 }
 0x447   : > { %v841_v16 = vpop.xlane.xlu1 %840 }
 0x448   : > { %1172 = vrcp.f32 %v841_v16  ;;  %v835_v17 = vpop.xlane.xlu0 %834 }
 0x449   : > { %v1163_v60 = vpop.eup %1162  ;;  %1174 = vrcp.f32 %v835_v17 }
 0x44a   : > { %v876_v61 = vmul.f32 %v1163_v60, %v1478_v11 }
 0x44b   : > { %v837_v62 = vpop.xlane.xlu1 %836 }
 0x44c   : > { %893 = vst.msk [vmem:[%s1538_s19 + $0x10] sm:$0xff] %vm890_vm3, %v876_v61  ;;  %1176 = vrcp.f32 %v837_v62  ;;  %v847_v63 = vpop.xlane.xlu0 %846 }
 0x44d   : > { %v1165_v22 = vpop.eup %1164  ;;  %1178 = vrcp.f32 %v847_v63 }
 0x44e   : > { %v1167_v23 = vpop.eup %1166  ;;  %v877_v3 = vmul.f32 %v1165_v22, %v1483_v20 }
 0x44f   : > { %v874_v4 = vmul.f32 %v1167_v23, %v1485_v21  ;;  %v849_v28 = vpop.xlane.xlu1 %848 }
 0x450   : > { %894 = vst.msk [vmem:[%s1538_s19 + $0x18] sm:$0xff] %vm890_vm3, %v877_v3  ;;  %1180 = vrcp.f32 %v849_v28  ;;  %v843_v29 = vpop.xlane.xlu0 %842 }
 0x451   : > { %v1169_v5 = vpop.eup %1168  ;;  %891 = vst.msk [vmem:[%s1538_s19] sm:$0xff] %vm890_vm3, %v874_v4  ;;  %1182 = vrcp.f32 %v843_v29 }
 0x452   : > { %v1171_v34 = vpop.eup %1170  ;;  %v875_v35 = vmul.f32 %v1169_v5, %v1490_v30 }
 0x453   : > { %v880_v53 = vmul.f32 %v1171_v34, %v1492_v32  ;;  %v845_v40 = vpop.xlane.xlu1 %844 }
 0x454   : > { %892 = vst.msk [vmem:[%s1538_s19 + $0x8] sm:$0xff] %vm890_vm3, %v875_v35  ;;  %1184 = vrcp.f32 %v845_v40 }
 0x455   : > { %v1173_v41 = vpop.eup %1172  ;;  %897 = vst.msk [vmem:[%s1538_s19 + $0x30] sm:$0xff] %vm890_vm3, %v880_v53  ;;  %v851_v7 = vpop.xlane.xlu0 %850 }
 0x456   : > { %v1175_v10 = vpop.eup %1174  ;;  %v881_v11 = vmul.f32 %v1173_v41, %v1497_v38  ;;  %1186 = vrcp.f32 %v851_v7 }
 0x457   : > { %v878_v12 = vmul.f32 %v1175_v10, %v1499_v43 }
 0x458   : > { %898 = vst.msk [vmem:[%s1538_s19 + $0x38] sm:$0xff] %vm890_vm3, %v881_v11 }
 0x459   : > { %v1177_v13 = vpop.eup %1176  ;;  %895 = vst.msk [vmem:[%s1538_s19 + $0x20] sm:$0xff] %vm890_vm3, %v878_v12  ;;  %v853_v14 = vpop.xlane.xlu1 %852 }
 0x45a   : > { %v1179_v15 = vpop.eup %1178  ;;  %v879_v18 = vmul.f32 %v1177_v13, %v1505_v1  ;;  %1188 = vrcp.f32 %v853_v14  ;;  %v855_v19 = vpop.xlane.xlu0 %854 }
 0x45b   : > { %v884_v20 = vmul.f32 %v1179_v15, %v1507_v6  ;;  %1190 = vrcp.f32 %v855_v19 }
 0x45c   : > { %896 = vst.msk [vmem:[%s1538_s19 + $0x28] sm:$0xff] %vm890_vm3, %v879_v18 }
 0x45d   : > { %v1181_v21 = vpop.eup %1180  ;;  %901 = vst.msk [vmem:[%s1538_s19 + $0x50] sm:$0xff] %vm890_vm3, %v884_v20  ;;  %v857_v24 = vpop.xlane.xlu1 %856 }
 0x45e   : > { %v1183_v25 = vpop.eup %1182  ;;  %v885_v26 = vmul.f32 %v1181_v21, %v1512_v49  ;;  %1192 = vrcp.f32 %v857_v24 }
 0x45f   : > { %v882_v27 = vmul.f32 %v1183_v25, %v1514_v50 }
 0x460   : > { %902 = vst.msk [vmem:[%s1538_s19 + $0x58] sm:$0xff] %vm890_vm3, %v885_v26 }
 0x461   : > { %v1185_v30 = vpop.eup %1184  ;;  %899 = vst.msk [vmem:[%s1538_s19 + $0x40] sm:$0xff] %vm890_vm3, %v882_v27 }
 0x462   : > { %v883_v31 = vmul.f32 %v1185_v30, %v1518_v51 }
 0x463   : > { %v1187_v32 = vpop.eup %1186 }
 0x464   : > { %900 = vst.msk [vmem:[%s1538_s19 + $0x48] sm:$0xff] %vm890_vm3, %v883_v31  ;;  %v886_v33 = vmul.f32 %v1187_v32, %v1521_v8 }
 0x466   : > { %903 = vst.msk [vmem:[%s1538_s19 + $0x60] sm:$0xff] %vm890_vm3, %v886_v33 }
 0x467   : > { %v1189_v36 = vpop.eup %1188 }
 0x468   : > { %v1191_v37 = vpop.eup %1190  ;;  %v887_v38 = vmul.f32 %v1189_v36, %v1524_v52 }
 0x469   : > { %v888_v39 = vmul.f32 %v1191_v37, %v1526_v9 }
 0x46a   : > { %904 = vst.msk [vmem:[%s1538_s19 + $0x68] sm:$0xff] %vm890_vm3, %v887_v38 }
 0x46b   : > { %v1193_v42 = vpop.eup %1192  ;;  %905 = vst.msk [vmem:[%s1538_s19 + $0x70] sm:$0xff] %vm890_vm3, %v888_v39 }
 0x46c   : > { %v889_v43 = vmul.f32 %v1193_v42, %v1530_v54 }
 0x46e   : > { %906 = vst.msk [vmem:[%s1538_s19 + $0x78] sm:$0xff] %vm890_vm3, %v889_v43 }
 0x46f PF: > { %s12_s9 = sadd.s32 1, %s1200_s9  }
 0x470   : > { %p9_p4 = scmp.ge.s32.totalorder %s12_s9, 4  }
 0x472   :  { %11 = sbr.rel (!%p9_p4) target bundleno = 1 (0x1), region = 58 }

</bundles_post_ra>
